<compile_context>
chip_gen: v6e
topology: v6e:2x2x1
jax: 0.10.0
libtpu: 0.0.40
codegen_flags: <defaults>
</compile_context>

<pallas_src>
import functools

import jax
import jax.numpy as jnp
from jax import lax
from jax.experimental import pallas as pl
from jax.experimental.pallas import tpu as pltpu


def _distance_select_kernel(patches_ref, out_ref, *, p_norm, eps):
    """Farthest-from-mean selection per output location.

    patches_ref : VMEM (P, C, TL)  unfolded patch values (TL = lane tile of L)
    out_ref     : VMEM (C, TL)     selected patch element per (channel, location)
    """
    pv = patches_ref[...]                         # original dtype (exact gather)
    pf = pv.astype(jnp.float32)                   # score math in f32

    num_pos = pv.shape[0]                         # P = kh*kw (small, static)
    tl = pv.shape[2]

    # Mean over kernel positions (axis 0 is a major axis -> cheap VALU adds).
    mean = jnp.mean(pf, axis=0, keepdims=True)             # (1, C, TL)
    diff = pf - mean + eps                                  # PairwiseDistance: ||x1 - x2 + eps||_p

    # Lp selection score over channels (cross-sublane XLU reduce).  The outer
    # p-th root is monotone, so it is dropped: the argmax is unchanged.
    if p_norm == 2:
        score = jnp.sum(diff * diff, axis=1)                # (P, TL)
    elif p_norm == 1:
        score = jnp.sum(jnp.abs(diff), axis=1)
    else:
        score = jnp.sum(jnp.abs(diff) ** p_norm, axis=1)

    # Argmax over kernel positions with first-occurrence tie break, written as
    # min-of-masked-iota (robust lowering, stays on the VPU).
    smax = jnp.max(score, axis=0, keepdims=True)             # (1, TL)
    pos = lax.broadcasted_iota(jnp.int32, (num_pos, tl), 0)  # (P, TL)
    masked = jnp.where(score == smax, pos, num_pos)
    sel = jnp.min(masked, axis=0, keepdims=True)             # (1, TL)
    onehot = pos == sel                                       # (P, TL) bool

    # Vectorized gather: chain of vselects over the (small, static) P positions.
    out = pv[0]
    for k in range(1, num_pos):
        out = jnp.where(onehot[k:k + 1, :], pv[k], out)       # (C, TL)
    out_ref[...] = out


def _unfold(x, kernel_size, stride):
    """nn.Unfold as fused strided slices. x: (1, C, H, W) -> ((P, C, L), fh, fw)."""
    _, c, h, w = x.shape
    kh, kw = kernel_size
    fh = (h - kh) // stride + 1
    fw = (w - kw) // stride + 1
    slabs = []
    for i in range(kh):                     # nn.Unfold ordering: pos = i*kw + j
        for j in range(kw):
            slabs.append(x[0, :, i::stride, j::stride][:, :fh, :fw])   # (C, fh, fw)
    patches = jnp.stack(slabs, axis=0).reshape(kh * kw, c, fh * fw)    # (P, C, L)
    return patches, fh, fw


def _pick_lane_tile(total_l, num_pos, c, in_bytes, out_bytes,
                    budget_bytes=16 * 1024 * 1024, cap=4096):
    """Largest multiple-of-128 lane tile of L that fits a conservative VMEM budget."""
    per_lane = (2 * num_pos * c * in_bytes                       # double-buffered input block
                + 2 * c * out_bytes                              # double-buffered output block
                + 4 * (2 * num_pos * c + 4 * num_pos + 2 * c))   # rough f32 temporaries
    tl = budget_bytes // max(per_lane, 1)
    tl = (tl // 128) * 128
    tl = max(128, min(int(tl), int(cap)))
    # Never tile past the (128-rounded) problem size.
    tl = min(tl, ((total_l + 127) // 128) * 128)
    return int(tl)


def distance_sampling_forward(x, kernel_size=(2, 2), stride=2, p=2, eps=1e-6,
                              max_lane_tile=4096):
    """x: (1, C, H, W) -> (1, C, fh*fw). Matches DistanceSampling.forward."""
    b, c, h, w = x.shape
    assert b == 1, "DistanceSampling.forward only supports batch size 1"

    patches, fh, fw = _unfold(x, kernel_size, stride)       # (P, C, L)
    num_pos, _, total_l = patches.shape

    tl = _pick_lane_tile(total_l, num_pos, c,
                         patches.dtype.itemsize, x.dtype.itemsize,
                         cap=max_lane_tile)

    # Pad L up to a multiple of the lane tile: every block is lane-dense
    # (multiple of 128 -> unmasked stores) and the grid tiles evenly.
    l_pad = ((total_l + tl - 1) // tl) * tl
    if l_pad != total_l:
        patches = jnp.pad(patches, ((0, 0), (0, 0), (0, l_pad - total_l)))
    grid = (l_pad // tl,)

    out = pl.pallas_call(
        functools.partial(_distance_select_kernel, p_norm=p, eps=eps),
        out_shape=jax.ShapeDtypeStruct((c, l_pad), x.dtype),
        grid_spec=pltpu.PrefetchScalarGridSpec(
            num_scalar_prefetch=0,
            grid=grid,
            in_specs=[pl.BlockSpec((num_pos, c, tl), lambda i: (0, 0, i))],
            out_specs=pl.BlockSpec((c, tl), lambda i: (0, i)),
        ),
        compiler_params=pltpu.CompilerParams(
            dimension_semantics=("parallel",),             # megacore-shardable on v7x
            vmem_limit_bytes=32 * 1024 * 1024,             # safe on v5e/v6e/v7x
        ),
    )(patches)

    return out[:, :total_l][None]                           # (1, C, fh*fw)


def _reference(x, kernel_size, stride, p, eps):
    """Pure-JAX mirror of DistanceSampling.forward (faithful, with the p-th root)."""
    patches, fh, fw = _unfold(x, kernel_size, stride)        # (P, C, L)
    pf = patches.astype(jnp.float32)
    mean = pf.mean(axis=0, keepdims=True)
    diff = pf - mean + eps
    dist = jnp.sum(jnp.abs(diff) ** p, axis=1) ** (1.0 / p)  # PairwiseDistance
    sel = jnp.argmax(dist, axis=0)                           # first occurrence on ties
    ref = jnp.take_along_axis(patches, sel[None, None, :], axis=0)[0][None]
    return ref, fh, fw


def _check(x, kernel_size, stride, p, eps, max_lane_tile=4096):
    out = distance_sampling_forward(x, kernel_size=kernel_size, stride=stride,
                                    p=p, eps=eps, max_lane_tile=max_lane_tile)
    out = jax.block_until_ready(out)
    ref, fh, fw = _reference(x, kernel_size, stride, p, eps)
    assert out.shape == (1, x.shape[1], fh * fw), out.shape
    assert out.dtype == x.dtype
    assert jnp.array_equal(out, ref), "kernel output mismatch vs reference"


if __name__ == "__main__":
    key = jax.random.PRNGKey(0)
    k0, k1, k2 = jax.random.split(key, 3)

    # Case 1: module defaults — (1, 4, 16, 16), 2x2 kernel, stride 2, p=2.
    x0 = jax.random.normal(k0, (1, 4, 16, 16), dtype=jnp.float32)
    _check(x0, kernel_size=(2, 2), stride=2, p=2, eps=1e-6)

    # Case 2: overlapping 3x3/stride-1 window, forced small lane tile so the
    # grid actually iterates and the L-padding path is exercised.
    x1 = jax.random.normal(k1, (1, 8, 16, 16), dtype=jnp.float32)
    _check(x1, kernel_size=(3, 3), stride=1, p=2, eps=1e-6, max_lane_tile=128)

    # Case 3: bf16 input, L1 distance.
    x2 = jax.random.normal(k2, (1, 4, 16, 16), dtype=jnp.float32).astype(jnp.bfloat16)
    _check(x2, kernel_size=(2, 2), stride=2, p=1, eps=1e-6)

    print("KERNEL_OK")
</pallas_src>

<mosaic_0001>
module attributes {stable_mosaic.version = 11 : i64} {
  func.func @_distance_select_kernel(%arg0: i32, %arg1: memref<4x4x128xf32, #tpu.memory_space<vmem>>, %arg2: memref<4x128xf32, #tpu.memory_space<vmem>>) attributes {dimension_semantics = [#tpu.dimension_semantics<parallel>], iteration_bounds = array<i64: 1>, scalar_prefetch = 0 : i64, scratch_operands = 0 : i64, tpu.core_type = #tpu.core_type<tc>, window_params = [{transform_indices = @transform_0, window_bounds = array<i64: 4, 4, 128>}, {transform_indices = @transform_1, window_bounds = array<i64: 4, 128>}]} {
    %c0 = arith.constant 0 : index
    %c0_0 = arith.constant 0 : index
    %c0_1 = arith.constant 0 : index
    %0 = vector.load %arg1[%c0, %c0_0, %c0_1] : memref<4x4x128xf32, #tpu.memory_space<vmem>>, vector<4x4x128xf32>
    %cst = arith.constant dense<0.000000e+00> : vector<4x128xf32>
    %1 = vector.multi_reduction <add>, %0, %cst [0] : vector<4x4x128xf32> to vector<4x128xf32>
    %2 = vector.shape_cast %1 : vector<4x128xf32> to vector<1x4x128xf32>
    %cst_2 = arith.constant 4.000000e+00 : f32
    %3 = vector.broadcast %cst_2 : f32 to vector<1x4x128xf32>
    %4 = arith.divf %2, %3 : vector<1x4x128xf32>
    %5 = vector.broadcast %4 : vector<1x4x128xf32> to vector<4x4x128xf32>
    %6 = arith.subf %0, %5 : vector<4x4x128xf32>
    %cst_3 = arith.constant 9.99999997E-7 : f32
    %7 = vector.broadcast %cst_3 : f32 to vector<4x4x128xf32>
    %8 = arith.addf %6, %7 : vector<4x4x128xf32>
    %9 = arith.mulf %8, %8 : vector<4x4x128xf32>
    %cst_4 = arith.constant dense<0.000000e+00> : vector<4x128xf32>
    %10 = vector.multi_reduction <add>, %9, %cst_4 [1] : vector<4x4x128xf32> to vector<4x128xf32>
    %cst_5 = arith.constant dense<0xFF800000> : vector<128xf32>
    %11 = vector.multi_reduction <maximumf>, %10, %cst_5 [0] : vector<4x128xf32> to vector<128xf32>
    %12 = vector.shape_cast %11 : vector<128xf32> to vector<1x128xf32>
    %13 = tpu.iota {dimensions = array<i32: 0>} : vector<4x128xi32>
    %14 = vector.broadcast %12 : vector<1x128xf32> to vector<4x128xf32>
    %15 = arith.cmpf oeq, %10, %14 : vector<4x128xf32>
    %c4_i32 = arith.constant 4 : i32
    %16 = vector.broadcast %c4_i32 : i32 to vector<4x128xi32>
    %17 = arith.select %15, %13, %16 : vector<4x128xi1>, vector<4x128xi32>
    %cst_6 = arith.constant dense<2147483647> : vector<128xi32>
    %18 = vector.multi_reduction <minsi>, %17, %cst_6 [0] : vector<4x128xi32> to vector<128xi32>
    %19 = vector.shape_cast %18 : vector<128xi32> to vector<1x128xi32>
    %20 = vector.broadcast %19 : vector<1x128xi32> to vector<4x128xi32>
    %21 = arith.cmpi eq, %13, %20 : vector<4x128xi32>
    %22 = vector.extract_strided_slice %0 {offsets = [0, 0, 0], sizes = [1, 4, 128], strides = [1, 1, 1]} : vector<4x4x128xf32> to vector<1x4x128xf32>
    %23 = vector.shape_cast %22 : vector<1x4x128xf32> to vector<4x128xf32>
    %24 = vector.extract_strided_slice %21 {offsets = [1, 0], sizes = [1, 128], strides = [1, 1]} : vector<4x128xi1> to vector<1x128xi1>
    %25 = vector.extract_strided_slice %0 {offsets = [1, 0, 0], sizes = [1, 4, 128], strides = [1, 1, 1]} : vector<4x4x128xf32> to vector<1x4x128xf32>
    %26 = vector.shape_cast %25 : vector<1x4x128xf32> to vector<4x128xf32>
    %27 = vector.shape_cast %24 : vector<1x128xi1> to vector<1x128xi1>
    %28 = vector.broadcast %27 : vector<1x128xi1> to vector<4x128xi1>
    %29 = arith.select %28, %26, %23 : vector<4x128xi1>, vector<4x128xf32>
    %30 = vector.extract_strided_slice %21 {offsets = [2, 0], sizes = [1, 128], strides = [1, 1]} : vector<4x128xi1> to vector<1x128xi1>
    %31 = vector.extract_strided_slice %0 {offsets = [2, 0, 0], sizes = [1, 4, 128], strides = [1, 1, 1]} : vector<4x4x128xf32> to vector<1x4x128xf32>
    %32 = vector.shape_cast %31 : vector<1x4x128xf32> to vector<4x128xf32>
    %33 = vector.shape_cast %30 : vector<1x128xi1> to vector<1x128xi1>
    %34 = vector.broadcast %33 : vector<1x128xi1> to vector<4x128xi1>
    %35 = arith.select %34, %32, %29 : vector<4x128xi1>, vector<4x128xf32>
    %36 = vector.extract_strided_slice %21 {offsets = [3, 0], sizes = [1, 128], strides = [1, 1]} : vector<4x128xi1> to vector<1x128xi1>
    %37 = vector.extract_strided_slice %0 {offsets = [3, 0, 0], sizes = [1, 4, 128], strides = [1, 1, 1]} : vector<4x4x128xf32> to vector<1x4x128xf32>
    %38 = vector.shape_cast %37 : vector<1x4x128xf32> to vector<4x128xf32>
    %39 = vector.shape_cast %36 : vector<1x128xi1> to vector<1x128xi1>
    %40 = vector.broadcast %39 : vector<1x128xi1> to vector<4x128xi1>
    %41 = arith.select %40, %38, %35 : vector<4x128xi1>, vector<4x128xf32>
    %c0_7 = arith.constant 0 : index
    %c0_8 = arith.constant 0 : index
    %42 = vector.load %arg2[%c0_7, %c0_8] : memref<4x128xf32, #tpu.memory_space<vmem>>, vector<4x128xf32>
    tpu.vector_store %arg2[%c0_7, %c0_8], %41 {strides = array<i32>} : memref<4x128xf32, #tpu.memory_space<vmem>>, vector<4x128xf32>,
    return
  }
  func.func @transform_0(%arg0: i32) -> (i32, i32, i32) {
    %c0_i32 = arith.constant 0 : i32
    %c0_i32_0 = arith.constant 0 : i32
    %c0_i32_1 = arith.constant 0 : i32
    return %c0_i32, %c0_i32_0, %arg0 : i32, i32, i32
  }
  func.func @transform_1(%arg0: i32) -> (i32, i32) {
    %c0_i32 = arith.constant 0 : i32
    %c0_i32_0 = arith.constant 0 : i32
    return %c0_i32, %arg0 : i32, i32
  }
}

</mosaic_0001>

<bundles_post_ra>
// kernel: tpu_custom_call.1
= control target key start
LH: loop header
LB: loop body
LE: loop exit
PB: predicated region body
PF: predicated region fallthrough
CT: control target
= control target key end

     0   :  { %6 = vsyncpa [#allocation3], 0  ;;  %s345_s0 = inlined_call_operand.hbm [shape: f32[4,4,128], index: 0, kind: input, shape index: {}]   ;;  %s346_s1 = inlined_call_operand.hbm [shape: f32[4,128], index: 1, kind: output, shape index: {}]  }
   0x1   :  { %7 = vsyncpa [#allocation4], 0  ;;  %s257_s6 = smov [#allocation2]  }
   0x2   :  { %s13_s7 = sshll.u32 %s257_s6, 4  ;;  %s14_s7 = int_to_ptr.vmem [resolvable:$true] %s13_s7 }
   0x3   :  { %s221_s8 = scalar_lea.vmem %s14_s7, 256  ;;  %p226_p1 = scmp.lt.s32.totalorder %s14_s7, %s14_s7 }
   0x4   :  { %p222_p0 = scmp.ne.s32.totalorder %s14_s7, %s221_s8  ;;  %p227_p2 = scmp.lt.s32.totalorder %s221_s8, %s221_s8 }
   0x6   :  { %p228_p3 = por %p227_p2, %p226_p1 }
   0x8   :  { %p229_p4 = pnand %p228_p3, %p222_p0 }
   0xa   :  { %232 = shalt.err (!%p229_p4)
}
   0xb   :  { %s258_s9 = smov 64   ;;  %s259_s10 = smov 4  }
   0xc   :  { %19 = dma.hbm_to_vmem [thread:$0]  %s345_s0, 256, %s14_s7, [#allocation3], %s258_s9, %s258_s9, %s259_s10  }
   0xd   :  { %253 = dma.done.wait [#allocation3], 256  }
   0xe   :  { %254 = vsyncadd [#allocation3], 4294967040  ;;  %vm27_vm0 = vcmask 1043456   ;;  %v274_v0 = vld [vmem:[#allocation2] sm:$0xf]  ;;  %v80_v43 = vlaneseq  ;;  %vm93_vm1 = vcmask 1040384  }
   0xf   :  { %v276_v1 = vld [vmem:[#allocation2 + $0x4] sm:$0xf]  ;;  %v278_v2 = vld [vmem:[#allocation2 + $0x8] sm:$0xf]  ;;  %v280_v3 = vld [vmem:[#allocation2 + $0xc] sm:$0xf] }
  0x10   :  { %v28_v4 = vsel %vm27_vm0, %v274_v0, 0.0  ;;  %v29_v5 = vsel %vm27_vm0, %v276_v1, 0.0  ;;  %v31_v6 = vsel %vm27_vm0, %v278_v2, 0.0  ;;  %v33_v8 = vsel %vm27_vm0, %v280_v3, 0.0  ;;  %s260_s0 = smov [#allocation5]  }
  0x11   :  { %v30_v7 = vadd.f32 %v29_v5, %v28_v4  ;;  %v81_v52 = vshrl.u32 %v80_v43, 7  ;;  %vm184_vm10 = vcmask 1044484   ;;  %vm187_vm11 = vcmask 1045509   ;;  %s200_s13 = sshll.u32 %s260_s0, 4  ;;  %s201_s13 = int_to_ptr.vmem [resolvable:$true] %s200_s13 }
  0x12   :  { %vm190_vm12 = vcmask 1046534   ;;  %s233_s14 = scalar_lea.vmem %s201_s13, 64  ;;  %p238_p6 = scmp.lt.s32.totalorder %s201_s13, %s201_s13 }
  0x13   :  { %v32_v9 = vadd.f32 %v31_v6, %v30_v7  ;;  %v86_v56 = vrot.slane %v81_v52, 1  ;;  %v87_v57 = vrot.slane %v81_v52, 2  ;;  %v88_v58 = vrot.slane %v81_v52, 3  ;;  %p234_p5 = scmp.ne.s32.totalorder %s201_s13, %s233_s14  ;;  %p239_p7 = scmp.lt.s32.totalorder %s233_s14, %s233_s14 }
  0x15   :  { %v34_v10 = vadd.f32 %v33_v8, %v32_v9  ;;  %v106_v9 = vsub.s32 0, %v81_v52  ;;  %p240_p8 = por %p239_p7, %p238_p6 }
  0x17   :  { %v36_v11 = vmul.f32 0.25, %v34_v10  ;;  %p241_p9 = pnand %p240_p8, %p234_p5 }
  0x19   :  { %v37_v12 = vsub.f32 %v274_v0, %v36_v11  ;;  %v38_v13 = vsub.f32 %v276_v1, %v36_v11  ;;  %v39_v14 = vsub.f32 %v278_v2, %v36_v11  ;;  %v40_v15 = vsub.f32 %v280_v3, %v36_v11 }
  0x1a   :  { %v112_v11 = vrot.slane %v276_v1, 7 }
  0x1b   :  { %v41_v16 = vadd.f32 1e-06, %v37_v12  ;;  %v42_v17 = vadd.f32 1e-06, %v38_v13  ;;  %v43_v18 = vadd.f32 1e-06, %v39_v14 }
  0x1c   :  { %v44_v19 = vadd.f32 1e-06, %v40_v15  ;;  %v113_v12 = vrot.slane %v276_v1, 1  ;;  %v114_v13 = vrot.slane %v276_v1, 2  ;;  %v120_v15 = vrot.slane %v274_v0, 7 }
  0x1d   :  { %v45_v20 = vmul.f32 %v41_v16, %v41_v16  ;;  %v46_v21 = vmul.f32 %v42_v17, %v42_v17  ;;  %v47_v22 = vmul.f32 %v43_v18, %v43_v18  ;;  %v121_v16 = vrot.slane %v274_v0, 1 }
  0x1e   :  { %v48_v23 = vmul.f32 %v44_v19, %v44_v19  ;;  %v122_v17 = vrot.slane %v274_v0, 2 }
  0x1f   :  { %v49_v24 = vsel %vm27_vm0, %v45_v20, 0.0  ;;  %v56_v25 = vsel %vm27_vm0, %v46_v21, 0.0  ;;  %v63_v26 = vsel %vm27_vm0, %v47_v22, 0.0  ;;  %v132_v20 = vrot.slane %v278_v2, 6 }
  0x20   :  { %v50_v27 = vrot.slane %v49_v24, 4  ;;  %v57_v28 = vrot.slane %v56_v25, 4  ;;  %v64_v29 = vrot.slane %v63_v26, 4  ;;  %v70_v30 = vsel %vm27_vm0, %v48_v23, 0.0 }
  0x21   :  { %v71_v31 = vrot.slane %v70_v30, 4  ;;  %v133_v21 = vrot.slane %v278_v2, 7  ;;  %v134_v22 = vrot.slane %v278_v2, 1 }
  0x22   :  { %v51_v32 = vadd.f32 %v50_v27, %v49_v24  ;;  %v58_v33 = vadd.f32 %v57_v28, %v56_v25  ;;  %v65_v34 = vadd.f32 %v64_v29, %v63_v26 }
  0x23   :  { %v72_v35 = vadd.f32 %v71_v31, %v70_v30  ;;  %v156_v31 = vrot.slane %v280_v3, 5 }
  0x24   :  { %v52_v36 = vrot.slane %v51_v32, 2  ;;  %v59_v37 = vrot.slane %v58_v33, 2  ;;  %v66_v38 = vrot.slane %v65_v34, 2 }
  0x25   :  { %v73_v39 = vrot.slane %v72_v35, 2 }
  0x26   :  { %v53_v40 = vadd.f32 %v52_v36, %v51_v32  ;;  %v60_v41 = vadd.f32 %v59_v37, %v58_v33  ;;  %v67_v42 = vadd.f32 %v66_v38, %v65_v34  ;;  %v157_v32 = vrot.slane %v280_v3, 6 }
  0x27   :  { %v74_v44 = vadd.f32 %v73_v39, %v72_v35  ;;  %v158_v33 = vrot.slane %v280_v3, 7 }
  0x28   :  { %v54_v45 = vrot.slane %v53_v40, 1  ;;  %v61_v46 = vrot.slane %v60_v41, 1  ;;  %v68_v47 = vrot.slane %v67_v42, 1 }
  0x29   :  { %v75_v48 = vrot.slane %v74_v44, 1 }
  0x2a   :  { %v55_v49 = vadd.f32 %v54_v45, %v53_v40  ;;  %v62_v50 = vadd.f32 %v61_v46, %v60_v41  ;;  %v69_v51 = vadd.f32 %v68_v47, %v67_v42 }
  0x2b   :  { %v76_v53 = vadd.f32 %v75_v48, %v74_v44 }
  0x2c   :  { %v77_v54 = vmax.f32 %v55_v49, %v62_v50 }
  0x2d   :  { %v78_v55 = vmax.f32 %v69_v51, %v76_v53 }
  0x2f   :  { %v79_v59 = vmax.f32 %v77_v54, %v78_v55 }
  0x31   :  { %vm82_vm2 = vcmp.eq.f32.partialorder %v55_v49, %v79_v59  ;;  %vm83_vm3 = vcmp.eq.f32.partialorder %v62_v50, %v79_v59  ;;  %vm84_vm4 = vcmp.eq.f32.partialorder %v69_v51, %v79_v59  ;;  %vm85_vm5 = vcmp.eq.f32.partialorder %v76_v53, %v79_v59 }
  0x32   :  { %v89_v60 = vsel %vm82_vm2, %v81_v52, 4  ;;  %v90_v61 = vsel %vm83_vm3, %v86_v56, 4  ;;  %v91_v62 = vsel %vm84_vm4, %v87_v57, 4  ;;  %v92_v63 = vsel %vm85_vm5, %v88_v58, 4 }
  0x33   :  { %v94_v4 = vsel %vm93_vm1, %v89_v60, 2147483647  ;;  %v95_v5 = vsel %vm93_vm1, %v90_v61, 2147483647  ;;  %v96_v6 = vsel %vm93_vm1, %v91_v62, 2147483647 }
  0x34   :  { %v97_v7 = vsel %vm93_vm1, %v92_v63, 2147483647  ;;  %vm98_vm6 = vcmp.lt.s32.totalorder %v94_v4, %v95_v5 }
  0x35   :  { %v99_v8 = vsel %vm98_vm6, %v94_v4, %v95_v5  ;;  %vm100_vm7 = vcmp.lt.s32.totalorder %v96_v6, %v97_v7 }
  0x36   :  { %v101_v10 = vsel %vm100_vm7, %v96_v6, %v97_v7 }
  0x37   :  { %vm102_vm8 = vcmp.lt.s32.totalorder %v99_v8, %v101_v10 }
  0x38   :  { %v103_v14 = vsel %vm102_vm8, %v99_v8, %v101_v10 }
  0x39   :  { %v107_v18 = vrot.slane %v103_v14, %v106_v9 }
  0x3b   :  { %vm304_vm9 = vcmp.eq.s32.totalorder %v81_v52, %v107_v18 }
  0x3c   :  { %v127_v23 = vsel %vm304_vm9, %v112_v11, %v120_v15  ;;  %v128_v24 = vsel %vm304_vm9, %v276_v1, %v274_v0  ;;  %v129_v25 = vsel %vm304_vm9, %v113_v12, %v121_v16  ;;  %v130_v26 = vsel %vm304_vm9, %v114_v13, %v122_v17 }
  0x3d   :  { %v143_v27 = vrot.slane %v127_v23, 7  ;;  %v144_v28 = vrot.slane %v128_v24, 7  ;;  %v145_v29 = vrot.slane %v129_v25, 7  ;;  %v146_v30 = vrot.slane %v130_v26, 7 }
  0x3f   :  { %v151_v34 = vsel %vm304_vm9, %v132_v20, %v143_v27  ;;  %v152_v0 = vsel %vm304_vm9, %v133_v21, %v144_v28  ;;  %v153_v1 = vsel %vm304_vm9, %v278_v2, %v145_v29  ;;  %v154_v35 = vsel %vm304_vm9, %v134_v22, %v146_v30 }
  0x40   :  { %v167_v36 = vrot.slane %v151_v34, 7  ;;  %v168_v37 = vrot.slane %v152_v0, 7  ;;  %v169_v38 = vrot.slane %v153_v1, 7  ;;  %v170_v39 = vrot.slane %v154_v35, 7 }
  0x42   :  { %v175_v40 = vsel %vm304_vm9, %v156_v31, %v167_v36  ;;  %v176_v41 = vsel %vm304_vm9, %v157_v32, %v168_v37  ;;  %v177_v42 = vsel %vm304_vm9, %v158_v33, %v169_v38  ;;  %v178_v2 = vsel %vm304_vm9, %v280_v3, %v170_v39 }
  0x43   :  { %v183_v43 = vrot.slane %v176_v41, 7  ;;  %v186_v44 = vrot.slane %v177_v42, 6  ;;  %v189_v45 = vrot.slane %v178_v2, 5 }
  0x45   :  { %v185_v46 = vsel %vm184_vm10, %v183_v43, %v175_v40 }
  0x46   :  { %v188_v47 = vsel %vm187_vm11, %v186_v44, %v185_v46 }
  0x47   :  { %v191_v48 = vsel %vm190_vm12, %v189_v45, %v188_v47 }
  0x48   :  { %193 = vst [vmem:[#allocation5 - $0x3] sm:$0x78] %v191_v48 }
  0x49   :  { %244 = shalt.err (!%p241_p9)
}
  0x4a   :  { %203 = dma.vmem_to_hbm [thread:$0]  %s201_s13, 64, %s346_s1, [#allocation4]  }
  0x4b   :  { %255 = dma.done.wait [#allocation4], 64  }
  0x4c   :  { %256 = vsyncadd [#allocation4], 4294967232 }
  0x4d   :  { %207 = vsyncpa [#allocation3], 1 }
  0x4e   :  { %208 = vsyncpa [#allocation4], 1 }

</bundles_post_ra>
